<compile_context>
chip_gen: v7x
topology: tpu7x:2x2x1
jax: 0.10.0
libtpu: 0.0.40
codegen_flags: <defaults>
</compile_context>

<pallas_src>
import math
import functools

import jax
import jax.numpy as jnp
from jax.experimental import pallas as pl
from jax.experimental.pallas import tpu as pltpu


def _round_up(x, m):
    return ((x + m - 1) // m) * m


# --------------------------- tiled matmul kernel ---------------------------- #

def _matmul_kernel(a_ref, b_ref, o_ref, acc_ref):
    @pl.when(pl.program_id(2) == 0)
    def _():
        acc_ref[...] = jnp.zeros_like(acc_ref)

    acc_ref[...] += jnp.dot(a_ref[...], b_ref[...],
                            preferred_element_type=jnp.float32)

    @pl.when(pl.program_id(2) == pl.num_programs(2) - 1)
    def _():
        o_ref[...] = acc_ref[...].astype(o_ref.dtype)


def pallas_matmul(a, b, *, tm=256, tn=256, tk=512):
    """C = A @ B, bf16 operands / fp32 accumulation, arbitrary shapes (padded)."""
    M, K = a.shape
    K2, N = b.shape
    assert K == K2
    tm = min(tm, _round_up(M, 8))
    tn = min(tn, _round_up(N, 128))
    tk = min(tk, _round_up(K, 128))
    Mp, Kp, Npad = _round_up(M, tm), _round_up(K, tk), _round_up(N, tn)

    a_p = jnp.pad(a.astype(jnp.bfloat16), ((0, Mp - M), (0, Kp - K)))
    b_p = jnp.pad(b.astype(jnp.bfloat16), ((0, Kp - K), (0, Npad - N)))

    out = pl.pallas_call(
        _matmul_kernel,
        grid=(Mp // tm, Npad // tn, Kp // tk),
        in_specs=[pl.BlockSpec((tm, tk), lambda i, j, k: (i, k)),
                  pl.BlockSpec((tk, tn), lambda i, j, k: (k, j))],
        out_specs=pl.BlockSpec((tm, tn), lambda i, j, k: (i, j)),
        out_shape=jax.ShapeDtypeStruct((Mp, Npad), jnp.float32),
        scratch_shapes=[pltpu.VMEM((tm, tn), jnp.float32)],
        compiler_params=pltpu.CompilerParams(
            dimension_semantics=("parallel", "parallel", "arbitrary")),
    )(a_p, b_p)
    return out[:M, :N]


# --------------------- fused residual-attention block ----------------------- #

def _resblock_kernel(x_ref,
                     lnpre_w, lnpre_b,
                     ln1w, ln1b, wqkv, bqkv, wo, bo,
                     ln2w, ln2b, wfc, bfc, wpr, bpr,
                     lnpost_w, lnpost_b,
                     o_ref, attn_scr,
                     *, n_head, n_real, apply_pre, apply_post):
    Bb, N, D = x_ref.shape
    Dh = D // n_head
    scale = 1.0 / math.sqrt(Dh)
    M = Bb * N

    def ln(v, w_r, b_r):
        mu = jnp.mean(v, axis=-1, keepdims=True)
        var = jnp.mean((v - mu) ** 2, axis=-1, keepdims=True)
        return (v - mu) * jax.lax.rsqrt(var + 1e-5) * w_r[...] + b_r[...]

    x = x_ref[...].astype(jnp.float32)          # (Bb, N, D) residual stream, fp32
    if apply_pre:                               # fused ln_pre (first layer only)
        x = ln(x, lnpre_w, lnpre_b)

    # ---------------- x = x + MHA(ln_1(x)) ----------------
    h = ln(x, ln1w, ln1b).reshape(M, D).astype(jnp.bfloat16)
    qkv = jnp.dot(h, wqkv[...], preferred_element_type=jnp.float32) + bqkv[...]
    qkv = qkv.reshape(Bb, N, 3 * D)
    q = qkv[:, :, 0:D] * scale                  # fold 1/sqrt(Dh) into q
    k = qkv[:, :, D:2 * D]
    v = qkv[:, :, 2 * D:3 * D]

    if n_real < N:                              # mask padded key positions
        kidx = jax.lax.broadcasted_iota(jnp.int32, (1, 1, N), 2)
        neg = jnp.where(kidx < n_real, 0.0, -1e30).astype(jnp.float32)
    else:
        neg = None

    for hh in range(n_head):
        sl = slice(hh * Dh, (hh + 1) * Dh)
        qh = q[:, :, sl].astype(jnp.bfloat16)
        kh = k[:, :, sl].astype(jnp.bfloat16)
        vh = v[:, :, sl].astype(jnp.bfloat16)
        s = jnp.einsum('bqd,bkd->bqk', qh, kh,
                       preferred_element_type=jnp.float32)
        if neg is not None:
            s = s + neg
        s = s - jnp.max(s, axis=-1, keepdims=True)
        p = jnp.exp(s)
        p = p * pl.reciprocal(jnp.sum(p, axis=-1, keepdims=True), approx=True)
        attn_scr[:, :, sl] = jnp.einsum('bqk,bkd->bqd', p.astype(jnp.bfloat16),
                                        vh, preferred_element_type=jnp.float32)

    attn = attn_scr[...].reshape(M, D).astype(jnp.bfloat16)
    attn = jnp.dot(attn, wo[...], preferred_element_type=jnp.float32) + bo[...]
    x = x + attn.reshape(Bb, N, D)

    # ---------------- x = x + MLP(ln_2(x)) ----------------
    h2 = ln(x, ln2w, ln2b).reshape(M, D).astype(jnp.bfloat16)
    hm = jnp.dot(h2, wfc[...], preferred_element_type=jnp.float32) + bfc[...]
    hm = (hm * jax.nn.sigmoid(1.702 * hm)).astype(jnp.bfloat16)    # QuickGELU
    m = jnp.dot(hm, wpr[...], preferred_element_type=jnp.float32) + bpr[...]
    x = x + m.reshape(Bb, N, D)

    if apply_post:                              # fused ln_post (last layer only)
        x = ln(x, lnpost_w, lnpost_b)

    o_ref[...] = x.astype(o_ref.dtype)


def pallas_resblock(x, blk, lnpre_w, lnpre_b, lnpost_w, lnpost_b, *,
                    n_head, n_real, apply_pre, apply_post, bb):
    BT, N, D = x.shape
    assert BT % bb == 0 and D % n_head == 0
    kernel = functools.partial(_resblock_kernel, n_head=n_head, n_real=n_real,
                               apply_pre=apply_pre, apply_post=apply_post)

    def rep(shape):                 # full (replicated) weight block
        return pl.BlockSpec(shape, lambda b: (0,) * len(shape))

    in_specs = [
        pl.BlockSpec((bb, N, D), lambda b: (b, 0, 0)),     # x
        rep((1, D)), rep((1, D)),                          # ln_pre (maybe unused)
        rep((1, D)), rep((1, D)),                          # ln_1
        rep((D, 3 * D)), rep((1, 3 * D)),                  # in_proj W^T, b
        rep((D, D)), rep((1, D)),                          # out_proj
        rep((1, D)), rep((1, D)),                          # ln_2
        rep((D, 4 * D)), rep((1, 4 * D)),                  # c_fc
        rep((4 * D, D)), rep((1, D)),                      # c_proj
        rep((1, D)), rep((1, D)),                          # ln_post (maybe unused)
    ]

    # VMEM budget: double-buffered bf16 weights + activation tiles + slack.
    w_bytes = sum(int(blk[k].size) * blk[k].dtype.itemsize
                  for k in ("w_qkv", "w_o", "w_fc", "w_proj"))
    act_bytes = bb * N * D * 4
    vmem_limit = int(min(100 * 2 ** 20,
                         max(32 * 2 ** 20,
                             2 * w_bytes + 24 * act_bytes + (4 << 20))))

    return pl.pallas_call(
        kernel,
        grid=(BT // bb,),
        in_specs=in_specs,
        out_specs=pl.BlockSpec((bb, N, D), lambda b: (b, 0, 0)),
        out_shape=jax.ShapeDtypeStruct((BT, N, D), x.dtype),
        scratch_shapes=[pltpu.VMEM((bb, N, D), jnp.float32)],
        compiler_params=pltpu.CompilerParams(
            dimension_semantics=("parallel",),
            vmem_limit_bytes=vmem_limit),
    )(x, lnpre_w, lnpre_b,
      blk["ln1_w"], blk["ln1_b"], blk["w_qkv"], blk["b_qkv"],
      blk["w_o"], blk["b_o"], blk["ln2_w"], blk["ln2_b"],
      blk["w_fc"], blk["b_fc"], blk["w_proj"], blk["b_proj"],
      lnpost_w, lnpost_b)


def _pick_batch_block(BT, cap=8):
    # Use a smaller cap on v7x (64 MiB VMEM) for very large models if needed.
    for bb in range(min(cap, BT), 0, -1):
        if BT % bb == 0:
            return bb
    return 1


# ------------------------------ parameters --------------------------------- #

def init_params(key, *, width, layers, heads, patch_size, num_frames,
                input_resolution):
    del heads
    D = width
    Np = (input_resolution // patch_size) ** 2
    keys = jax.random.split(key, 4 + max(layers, 1))
    scale = D ** -0.5
    params = {
        # Matmul weights stored in bf16 (fp32 accumulation in the kernels).
        "conv_w": (0.02 * jax.random.normal(
            keys[0], (D, 3, patch_size, patch_size), jnp.float32)
        ).astype(jnp.bfloat16),
        "class_embedding": scale * jax.random.normal(keys[1], (D,), jnp.float32),
        "positional_embedding": scale * jax.random.normal(
            keys[2], (Np + 1, D), jnp.float32),
        "temporal_embedding": jnp.zeros((1, num_frames, D), jnp.float32),
        "ln_pre_w": jnp.ones((1, D), jnp.float32),
        "ln_pre_b": jnp.zeros((1, D), jnp.float32),
        "ln_post_w": jnp.ones((1, D), jnp.float32),
        "ln_post_b": jnp.zeros((1, D), jnp.float32),
        "blocks": [],
    }
    for l in range(layers):
        bk = jax.random.split(keys[4 + l], 4)
        params["blocks"].append({
            "ln1_w": jnp.ones((1, D), jnp.float32),
            "ln1_b": jnp.zeros((1, D), jnp.float32),
            # PyTorch Linear weight is (out, in); we store W^T (in, out) in bf16.
            "w_qkv": (0.02 * jax.random.normal(bk[0], (D, 3 * D), jnp.float32)
                      ).astype(jnp.bfloat16),
            "b_qkv": jnp.zeros((1, 3 * D), jnp.float32),
            "w_o": (0.02 * jax.random.normal(bk[1], (D, D), jnp.float32)
                    ).astype(jnp.bfloat16),
            "b_o": jnp.zeros((1, D), jnp.float32),
            "ln2_w": jnp.ones((1, D), jnp.float32),
            "ln2_b": jnp.zeros((1, D), jnp.float32),
            "w_fc": (0.02 * jax.random.normal(bk[2], (D, 4 * D), jnp.float32)
                     ).astype(jnp.bfloat16),
            "b_fc": jnp.zeros((1, 4 * D), jnp.float32),
            "w_proj": (0.02 * jax.random.normal(bk[3], (4 * D, D), jnp.float32)
                       ).astype(jnp.bfloat16),
            "b_proj": jnp.zeros((1, D), jnp.float32),
        })
    return params


# ------------------------------ forward pass -------------------------------- #

def vit_clip_forward(x, params, *, patch_size, width, heads, num_frames):
    B, C, T, H, W = x.shape
    assert T == num_frames, f"{T} != {num_frames}"
    D = width
    p = patch_size
    Hp, Wp = H // p, W // p
    Np = Hp * Wp
    N = Np + 1
    BT = B * T

    # 'b c t h w -> (b t) c h w'
    xr = jnp.transpose(x, (0, 2, 1, 3, 4)).reshape(BT, C, H, W)

    # conv1 (patchify, stride == kernel) lowered to a tiled Pallas matmul
    patches = xr.reshape(BT, C, Hp, p, Wp, p)
    patches = jnp.transpose(patches, (0, 2, 4, 1, 3, 5)).reshape(BT * Np, C * p * p)
    w_conv = params["conv_w"].reshape(D, C * p * p).T          # (C*p*p, D) bf16
    feat = pallas_matmul(patches, w_conv).reshape(BT, Np, D)   # fp32

    # class token + positional embedding
    cls = jnp.broadcast_to(
        params["class_embedding"].astype(feat.dtype)[None, None, :], (BT, 1, D))
    xt = jnp.concatenate([cls, feat], axis=1)                  # (BT, N, D)
    xt = xt + params["positional_embedding"][None]

    # temporal embedding: '(b t) n d -> (b n) t d' add, then back
    xt = xt.reshape(B, T, N, D).transpose(0, 2, 1, 3)
    xt = xt + params["temporal_embedding"]
    xt = xt.transpose(0, 2, 1, 3).reshape(BT, N, D)

    blocks = params["blocks"]
    L = len(blocks)
    if L == 0:
        # degenerate config: plain ln_pre + ln_post, no transformer layers
        def jln(v, w, b):
            mu = jnp.mean(v, -1, keepdims=True)
            var = jnp.mean((v - mu) ** 2, -1, keepdims=True)
            return (v - mu) * jax.lax.rsqrt(var + 1e-5) * w + b
        xt = jln(xt, params["ln_pre_w"], params["ln_pre_b"])
        xt = jln(xt, params["ln_post_w"], params["ln_post_b"])
    else:
        # pad tokens to a sublane multiple so in-kernel reshapes are aligned;
        # padded key positions are masked inside the attention kernel and the
        # padded rows are dropped afterwards.  ln_pre / ln_post are fused into
        # the first / last block.
        Npad = _round_up(N, 8)
        if Npad != N:
            xt = jnp.pad(xt, ((0, 0), (0, Npad - N), (0, 0)))
        bb = _pick_batch_block(BT)
        for li, blk in enumerate(blocks):
            xt = pallas_resblock(
                xt, blk,
                params["ln_pre_w"], params["ln_pre_b"],
                params["ln_post_w"], params["ln_post_b"],
                n_head=heads, n_real=N, bb=bb,
                apply_pre=(li == 0), apply_post=(li == L - 1))
        xt = xt[:, :N, :]

    # TODO(synk): AttentivePooler (adaptation_type='frozen_tuning') source is not
    # provided; implement the non-pooler branch (x = x[0] -> class token).
    out = xt[:, 0, :]                                          # (BT, D)
    return out[:, :, None, None, None]                         # (BT, D, 1, 1, 1)


# --------------------------------- main ------------------------------------- #

if __name__ == "__main__":
    key = jax.random.PRNGKey(0)
    B, C, T, H, W = 2, 3, 2, 16, 16          # num_frames = 2
    patch_size, width, layers, heads = 8, 32, 2, 4

    kx, kp = jax.random.split(key)
    x = jax.random.normal(kx, (B, C, T, H, W), jnp.float32)
    params = init_params(kp, width=width, layers=layers, heads=heads,
                         patch_size=patch_size, num_frames=T, input_resolution=H)

    out = vit_clip_forward(x, params, patch_size=patch_size, width=width,
                           heads=heads, num_frames=T)
    jax.block_until_ready(out)
    assert out.shape == (B * T, width, 1, 1, 1), out.shape
    print("KERNEL_OK")
</pallas_src>

<mosaic_0001>
module attributes {stable_mosaic.version = 11 : i64} {
  func.func @_matmul_kernel(%arg0: i32, %arg1: i32, %arg2: i32, %arg3: memref<16x256xbf16, #tpu.memory_space<vmem>>, %arg4: memref<256x128xbf16, #tpu.memory_space<vmem>>, %arg5: memref<16x128xf32, #tpu.memory_space<vmem>>, %arg6: memref<16x128xf32, #tpu.memory_space<vmem>>) attributes {dimension_semantics = [#tpu.dimension_semantics<parallel>, #tpu.dimension_semantics<parallel>, #tpu.dimension_semantics<arbitrary>], iteration_bounds = array<i64: 1, 1, 1>, scalar_prefetch = 0 : i64, scratch_operands = 1 : i64, tpu.core_type = #tpu.core_type<tc>, window_params = [{transform_indices = @transform_0, window_bounds = array<i64: 16, 256>}, {transform_indices = @transform_1, window_bounds = array<i64: 256, 128>}, {transform_indices = @transform_2, window_bounds = array<i64: 16, 128>}]} {
    %c0_i32 = arith.constant 0 : i32
    %0 = arith.cmpi eq, %arg2, %c0_i32 : i32
    %1 = arith.extui %0 : i1 to i32
    %c0_i32_0 = arith.constant 0 : i32
    %2 = arith.cmpi ne, %1, %c0_i32_0 : i32
    scf.if %2 {
      %cst_10 = arith.constant 0.000000e+00 : f32
      %12 = vector.broadcast %cst_10 : f32 to vector<16x128xf32>
      %c0_11 = arith.constant 0 : index
      %c0_12 = arith.constant 0 : index
      %13 = vector.load %arg6[%c0_11, %c0_12] : memref<16x128xf32, #tpu.memory_space<vmem>>, vector<16x128xf32>
      tpu.vector_store %arg6[%c0_11, %c0_12], %12 {strides = array<i32>} : memref<16x128xf32, #tpu.memory_space<vmem>>, vector<16x128xf32>,
    } else {
    }
    %c0 = arith.constant 0 : index
    %c0_1 = arith.constant 0 : index
    %3 = vector.load %arg6[%c0, %c0_1] : memref<16x128xf32, #tpu.memory_space<vmem>>, vector<16x128xf32>
    %c0_2 = arith.constant 0 : index
    %c0_3 = arith.constant 0 : index
    %4 = vector.load %arg3[%c0_2, %c0_3] : memref<16x256xbf16, #tpu.memory_space<vmem>>, vector<16x256xbf16>
    %c0_4 = arith.constant 0 : index
    %c0_5 = arith.constant 0 : index
    %5 = vector.load %arg4[%c0_4, %c0_5] : memref<256x128xbf16, #tpu.memory_space<vmem>>, vector<256x128xbf16>
    %cst = arith.constant dense<0.000000e+00> : vector<16x128xf32>
    %6 = tpu.matmul %4, %5, %cst {dimension_numbers = #tpu.dot_dimension_numbers<[1], [0], [0], [1], [0, 0, 1, 1], [], []>} : vector<16x256xbf16>, vector<256x128xbf16>, vector<16x128xf32> -> vector<16x128xf32>
    %7 = arith.addf %3, %6 : vector<16x128xf32>
    %c0_6 = arith.constant 0 : index
    %c0_7 = arith.constant 0 : index
    %8 = vector.load %arg6[%c0_6, %c0_7] : memref<16x128xf32, #tpu.memory_space<vmem>>, vector<16x128xf32>
    tpu.vector_store %arg6[%c0_6, %c0_7], %7 {strides = array<i32>} : memref<16x128xf32, #tpu.memory_space<vmem>>, vector<16x128xf32>,
    %c0_i32_8 = arith.constant 0 : i32
    %9 = arith.cmpi eq, %arg2, %c0_i32_8 : i32
    %10 = arith.extui %9 : i1 to i32
    %c0_i32_9 = arith.constant 0 : i32
    %11 = arith.cmpi ne, %10, %c0_i32_9 : i32
    scf.if %11 {
      %c0_10 = arith.constant 0 : index
      %c0_11 = arith.constant 0 : index
      %12 = vector.load %arg6[%c0_10, %c0_11] : memref<16x128xf32, #tpu.memory_space<vmem>>, vector<16x128xf32>
      %c0_12 = arith.constant 0 : index
      %c0_13 = arith.constant 0 : index
      %13 = vector.load %arg5[%c0_12, %c0_13] : memref<16x128xf32, #tpu.memory_space<vmem>>, vector<16x128xf32>
      tpu.vector_store %arg5[%c0_12, %c0_13], %12 {strides = array<i32>} : memref<16x128xf32, #tpu.memory_space<vmem>>, vector<16x128xf32>,
    } else {
    }
    return
  }
  func.func @transform_0(%arg0: i32, %arg1: i32, %arg2: i32) -> (i32, i32) {
    %c0_i32 = arith.constant 0 : i32
    return %arg0, %arg2 : i32, i32
  }
  func.func @transform_1(%arg0: i32, %arg1: i32, %arg2: i32) -> (i32, i32) {
    %c0_i32 = arith.constant 0 : i32
    return %arg2, %arg1 : i32, i32
  }
  func.func @transform_2(%arg0: i32, %arg1: i32, %arg2: i32) -> (i32, i32) {
    %c0_i32 = arith.constant 0 : i32
    return %arg0, %arg1 : i32, i32
  }
}

</mosaic_0001>

<bundles_post_ra>
// kernel: tpu_custom_call.1
= control target key start
LH: loop header
LB: loop body
LE: loop exit
PB: predicated region body
PF: predicated region fallthrough
CT: control target
= control target key end

     0   :  { %7 = vsyncpa [#allocation4], 0  ;;  %s461_s0 = inlined_call_operand.hbm [shape: bf16[16,256], index: 0, kind: input, shape index: {}]   ;;  %s462_s1 = inlined_call_operand.hbm [shape: bf16[256,128], index: 1, kind: input, shape index: {}]   ;;  %s463_s2 = inlined_call_operand.hbm [shape: f32[16,128], index: 2, kind: output, shape index: {}]  }
   0x1   :  { %8 = vsyncpa [#allocation7], 0 }
   0x2   :  { %9 = vsyncpa [#allocation5], 0  ;;  %s397_s9 = smov [#allocation3]   ;;  %s325_s13 = scalar_lea.hbm %s461_s0, 256 }
   0x3   :  { %s15_s10 = sshll.u32 %s397_s9, 4  ;;  %p326_p0 = scmp.ne.s32.totalorder %s461_s0, %s325_s13  ;;  %s16_s10 = int_to_ptr.vmem [resolvable:$true] %s15_s10 }
   0x4   :  { %p329_p1 = scmp.lt.u32.totalorder %s325_s13, %s461_s0 }
   0x6   :  { %p331_p2 = pnand %p329_p1, %p326_p0 }
   0x8   :  { %334 = shalt.err (!%p331_p2)
}
   0x9   :  { %s335_s18 = scalar_lea.vmem %s16_s10, 256  ;;  %p340_p4 = scmp.lt.s32.totalorder %s16_s10, %s16_s10 }
   0xa   :  { %p336_p3 = scmp.ne.s32.totalorder %s16_s10, %s335_s18  ;;  %p341_p5 = scmp.lt.s32.totalorder %s335_s18, %s335_s18 }
   0xc   :  { %p342_p6 = por %p341_p5, %p340_p4 }
   0xe   :  { %p343_p7 = pnand %p342_p6, %p336_p3 }
  0x10   :  { %346 = shalt.err (!%p343_p7)
}
  0x11   :  { %s398_s19 = smov 128   ;;  %s399_s20 = smov 8  }
  0x12   :  { %21 = dma.hbm_to_vmem [thread:$0]  %s461_s0, 256, %s16_s10, [#allocation4], %s398_s19, %s398_s19, %s399_s20  }
  0x13   :  { %s400_s23 = smov [#allocation6]   ;;  %s347_s27 = scalar_lea.hbm %s462_s1, 2048 }
  0x14   :  { %s27_s24 = sshll.u32 %s400_s23, 4  ;;  %p348_p8 = scmp.ne.s32.totalorder %s462_s1, %s347_s27  ;;  %s28_s24 = int_to_ptr.vmem [resolvable:$true] %s27_s24 }
  0x15   :  { %p351_p9 = scmp.lt.u32.totalorder %s347_s27, %s462_s1 }
  0x17   :  { %p353_p10 = pnand %p351_p9, %p348_p8 }
  0x19   :  { %356 = shalt.err (!%p353_p10)
}
  0x1a   :  { %s357_s4 = scalar_lea.vmem %s28_s24, 2048  ;;  %p362_p12 = scmp.lt.s32.totalorder %s28_s24, %s28_s24 }
  0x1b   :  { %p358_p11 = scmp.ne.s32.totalorder %s28_s24, %s357_s4  ;;  %p363_p13 = scmp.lt.s32.totalorder %s357_s4, %s357_s4 }
  0x1d   :  { %p364_p0 = por %p363_p13, %p362_p12 }
  0x1f   :  { %p365_p1 = pnand %p364_p0, %p358_p11 }
  0x21   :  { %368 = shalt.err (!%p365_p1)
}
  0x22   :  { %s401_s0 = smov 64   ;;  %s402_s5 = smov 4  }
  0x23   :  { %33 = dma.hbm_to_vmem [thread:$0]  %s462_s1, 2048, %s28_s24, [#allocation7], %s401_s0, %s401_s0, %s402_s5  }
  0x24   :  { %391 = dma.done.wait [#allocation4], 256  }
  0x25   :  { %392 = vsyncadd [#allocation4], 4294967040 }
  0x26   :  { %393 = dma.done.wait [#allocation7], 2048  }
  0x27   :  { %394 = vsyncadd [#allocation7], 4294965248  ;;  %v306_v0 = vld [vmem:[#allocation6 + $0x40] sm:$0xff]   ;;  %v308_v2 = vld [vmem:[#allocation6 + $0x48] sm:$0xff]   ;;  %s403_s1 = smov [#allocation8]  }
  0x28   :  { %v307_v1 = vld [vmem:[#allocation6] sm:$0xff]   ;;  %277 = vmatprep.subr.bf16.mxu0 %v306_v0  ;;  %v309_v3 = vld [vmem:[#allocation6 + $0x8] sm:$0xff]   ;;  %v310_v4 = vld [vmem:[#allocation6 + $0x50] sm:$0xff]   ;;  %s246_s8 = sshll.u32 %s403_s1, 4  ;;  %s247_s8 = int_to_ptr.vmem [resolvable:$true] %s246_s8 }
  0x29   :  { %278 = vmatpush3.bf16.msra.mxu0 %v307_v1  ;;  %v311_v5 = vld [vmem:[#allocation6 + $0x10] sm:$0xff]   ;;  %v312_v6 = vld [vmem:[#allocation6 + $0x58] sm:$0xff]   ;;  %v314_v8 = vld [vmem:[#allocation6 + $0x60] sm:$0xff]   ;;  %s369_s9 = scalar_lea.vmem %s247_s8, 256  ;;  %p374_p3 = scmp.lt.s32.totalorder %s247_s8, %s247_s8 }
  0x2a   :  { %279 = vmatprep.subr.bf16.mxu0 %v308_v2  ;;  %v313_v7 = vld [vmem:[#allocation6 + $0x18] sm:$0xff]   ;;  %v315_v9 = vld [vmem:[#allocation6 + $0x20] sm:$0xff]   ;;  %v316_v10 = vld [vmem:[#allocation6 + $0x68] sm:$0xff]   ;;  %p370_p2 = scmp.ne.s32.totalorder %s247_s8, %s369_s9  ;;  %p375_p4 = scmp.lt.s32.totalorder %s369_s9, %s369_s9 }
  0x2b   :  { %v324_v11 = vld [vmem:[#allocation3 + $0x4] ss:$8 sps:$4 sm:$0xff]   ;;  %v317_v12 = vld [vmem:[#allocation6 + $0x28] sm:$0xff]   ;;  %v322_v17 = vld [vmem:[#allocation3] ss:$8 sps:$4 sm:$0xff]  }
  0x2c   :  { %221 = vmatprep.mubr.bf16.mxu0 %v324_v11  ;;  %v318_v13 = vld [vmem:[#allocation6 + $0x70] sm:$0xff]   ;;  %v320_v15 = vld [vmem:[#allocation6 + $0x78] sm:$0xff]   ;;  %p376_p5 = por %p375_p4, %p374_p3 }
  0x2d   :  { %280 = vmatpush3.bf16.msra.mxu0 %v309_v3  ;;  %v319_v14 = vld [vmem:[#allocation6 + $0x30] sm:$0xff]   ;;  %v321_v16 = vld [vmem:[#allocation6 + $0x38] sm:$0xff]  }
  0x2e   :  { %281 = vmatprep.subr.bf16.mxu0 %v310_v4  ;;  %p377_p6 = pnand %p376_p5, %p370_p2 }
  0x31   :  { %282 = vmatpush3.bf16.msra.mxu0 %v311_v5 }
  0x32   :  { %283 = vmatprep.subr.bf16.mxu0 %v312_v6 }
  0x35   :  { %284 = vmatpush3.bf16.msra.mxu0 %v313_v7 }
  0x36   :  { %285 = vmatprep.subr.bf16.mxu0 %v314_v8 }
  0x39   :  { %286 = vmatpush3.bf16.msra.mxu0 %v315_v9 }
  0x3a   :  { %287 = vmatprep.subr.bf16.mxu0 %v316_v10 }
  0x3d   :  { %288 = vmatpush3.bf16.msra.mxu0 %v317_v12 }
  0x3e   :  { %289 = vmatprep.subr.bf16.mxu0 %v318_v13 }
  0x41   :  { %290 = vmatpush3.bf16.msra.mxu0 %v319_v14 }
  0x42   :  { %291 = vmatprep.subr.bf16.mxu0 %v320_v15 }
  0x45   :  { %292 = vmatpush3.bf16.msra.mxu0 %v321_v16 }
  0x48   :  { %222 = vmatmul.mubr.bf16.vlgmr.msra.gmra.mrb[0].mxu0 %v322_v17 }
 0x11b   :  { %v293_v18 = vpop.f32.mrb[0].mxu0 }
 0x11c   :  { %v294_v19 = vpop.f32.mrb[1].mxu0 }
 0x11d   :  { %v295_v20 = vadd.f32 %v294_v19, %v293_v18  ;;  %v296_v21 = vpop.f32.mrb[2].mxu0 }
 0x11e   :  { %v297_v22 = vpop.f32.mrb[3].mxu0 }
 0x11f   :  { %239 = vst [vmem:[#allocation8] sm:$0xff] %v295_v20  ;;  %v298_v23 = vadd.f32 %v297_v22, %v296_v21 }
 0x121   :  { %240 = vst [vmem:[#allocation8 + $0x8] sm:$0xff] %v298_v23 }
 0x122   :  { %380 = shalt.err (!%p377_p6)
}
 0x123   :  { %s381_s12 = scalar_lea.hbm %s463_s2, 256 }
 0x124   :  { %p382_p7 = scmp.ne.s32.totalorder %s463_s2, %s381_s12  ;;  %p385_p8 = scmp.lt.u32.totalorder %s381_s12, %s463_s2 }
 0x126   :  { %p387_p9 = pnand %p385_p8, %p382_p7 }
 0x128   :  { %390 = shalt.err (!%p387_p9)
}
 0x129   :  { %252 = dma.vmem_to_hbm [thread:$0]  %s247_s8, 256, %s463_s2, [#allocation5], %s398_s19, %s398_s19, %s399_s20  }
 0x12a   :  { %395 = dma.done.wait [#allocation5], 256  }
 0x12b   :  { %396 = vsyncadd [#allocation5], 4294967040 }
 0x12c   :  { %256 = vsyncpa [#allocation4], 1 }
 0x12d   :  { %257 = vsyncpa [#allocation7], 1 }
 0x12e   :  { %258 = vsyncpa [#allocation5], 1 }

</bundles_post_ra>
